<compile_context>
chip_gen: v7x
topology: tpu7x:2x2x1
jax: 0.10.0
libtpu: 0.0.40
codegen_flags: <defaults>
</compile_context>

<pallas_src>
import jax
import jax.numpy as jnp
from jax.experimental import pallas as pl
from jax.experimental.pallas import tpu as pltpu

STAGE_CHANNELS = ((3, 8), (8, 16), (16, 32), (32, 32))  # scaled-down stand-in (real: ... -> 2048)
NUM_STAGES = len(STAGE_CHANNELS)
TOTAL_STRIDE = 16        # ResNet-50 with strides (2, 2, 2, 1) -> /16 total downsampling
CPAD = 128               # channel padding so channels sit lane-dense on the 128-lane axis


# ----------------------------- Pallas kernel ------------------------------- #

def _fused_cam_kernel(x_ref, w_ref, wc_ref, o_ref):
    # x_ref:  [tm, CPAD]               bf16  pooled input pixels, channels zero-padded to 128
    # w_ref:  [NUM_STAGES, CPAD, CPAD] bf16  stand-in stage 1x1-conv weights (zero-padded)
    # wc_ref: [CPAD, CPAD]             bf16  classifier feature weights, lane-dense slab
    #                                        (only column 0 is non-zero)
    # o_ref:  [tm, CPAD]               f32   classifier feature logits (lane 0 meaningful)
    h = x_ref[...]
    # The kernel is store/overhead-bound at these widths, not MXU-bound; the matmul loop is
    # intentionally left simple (static unroll of 4 chained MXU matmuls + VPU ReLUs).
    for i in range(NUM_STAGES):
        acc = jnp.dot(h, w_ref[i], preferred_element_type=jnp.float32)
        h = jnp.maximum(acc, 0.0).astype(jnp.bfloat16)
    # classifier 1x1 conv, feature part only.  Lane-dense [tm, 128] result so the output
    # store is a full-width unmasked vst; the mt channel + ReLU happen in the XLA epilogue.
    o_ref[...] = jnp.dot(h, wc_ref[...], preferred_element_type=jnp.float32)


def _pick_tiles(n2):
    # Two "parallel" tiles (each a multiple of 16 rows for bf16 sublane packing) so the
    # grid shards across both TensorCores on v7x; otherwise one full-array tile so
    # single-TC chips (v5e/v6e) pay the ~0.35 us per-step overhead exactly once.
    if n2 % 32 == 0:
        return n2 // 2, 2
    return n2, 1


def _fused_cam_logits(x_pix, w_stages, wc_pad):
    n2 = x_pix.shape[0]
    tm, steps = _pick_tiles(n2)
    flops = 2 * n2 * CPAD * CPAD * (NUM_STAGES + 1)
    bytes_accessed = (x_pix.size * 2 + w_stages.size * 2 + wc_pad.size * 2 + n2 * CPAD * 4)
    return pl.pallas_call(
        _fused_cam_kernel,
        out_shape=jax.ShapeDtypeStruct((n2, CPAD), jnp.float32),
        grid=(steps,),
        in_specs=[
            pl.BlockSpec((tm, CPAD), lambda i: (i, 0)),
            pl.BlockSpec((NUM_STAGES, CPAD, CPAD), lambda i: (0, 0, 0)),
            pl.BlockSpec((CPAD, CPAD), lambda i: (0, 0)),
        ],
        out_specs=pl.BlockSpec((tm, CPAD), lambda i: (i, 0)),
        compiler_params=pltpu.CompilerParams(dimension_semantics=("parallel",)),
        cost_estimate=pl.CostEstimate(
            flops=flops, transcendentals=0, bytes_accessed=bytes_accessed),
    )(x_pix, w_stages, wc_pad)


# ------------------------------ parameters --------------------------------- #

def init_params(key, xm_flat_dim):
    ks = jax.random.split(key, NUM_STAGES + 2)

    def he(k, shape, fan_in):
        return jax.random.normal(k, shape, jnp.float32) / jnp.sqrt(float(fan_in))

    # Stage 1x1-conv weights, zero-padded to lane-dense [128, 128] slabs (bf16 for the MXU).
    w_stages = jnp.zeros((NUM_STAGES, CPAD, CPAD), jnp.float32)
    for i, (cin, cout) in enumerate(STAGE_CHANNELS):
        w_stages = w_stages.at[i, :cin, :cout].set(he(ks[i], (cin, cout), cin))

    # classifier = nn.Conv2d(C_feat + 1, 1, 1, bias=False); last input channel is the mt map.
    # Feature part is stored as a lane-dense [128, 128] slab with only column 0 non-zero so
    # the kernel's final dot / store are full-lane-width; the mt weight is a scalar applied
    # in the XLA epilogue.
    c_feat = STAGE_CHANNELS[-1][1]
    cls_w = he(ks[NUM_STAGES + 1], (c_feat + 1,), c_feat + 1)
    wc_pad = jnp.zeros((CPAD, CPAD), jnp.float32).at[:c_feat, 0].set(cls_w[:c_feat])

    return {
        "w_stages": w_stages.astype(jnp.bfloat16),
        "wc_pad": wc_pad.astype(jnp.bfloat16),
        "wc_mt": cls_w[c_feat],
        # TODO(synk): CausalPredictor(cfg, 513*513) internals unknown; linear stand-in weight.
        "causal_w": he(ks[NUM_STAGES], (xm_flat_dim, xm_flat_dim), xm_flat_dim),
    }


# ------------------------------ forward pass -------------------------------- #

@jax.jit
def cam_forward(params, x_nchw, xm):
    b, cin, h, w = x_nchw.shape
    hf, wf = h // TOTAL_STRIDE, w // TOTAL_STRIDE
    n2 = b * hf * wf

    x = jnp.transpose(x_nchw, (0, 2, 3, 1)).astype(jnp.float32)        # NCHW -> NHWC

    # TODO(synk): stand-in backbone (real ResNet-50 source not provided). Downsample once
    # (/16, matching strides (2,2,2,1)) with an average pool in XLA, then run the 4 stacked
    # 1x1-conv+ReLU stages (scaled-down channel widths) inside the single fused Pallas kernel.
    x = x.reshape(b, hf, TOTAL_STRIDE, wf, TOTAL_STRIDE, cin).mean(axis=(2, 4))

    # lane-dense [pixels, channels] with channels zero-padded to 128, bf16 for the MXU.
    x_pix = x.reshape(n2, cin)
    x_pix = jnp.pad(x_pix, ((0, 0), (0, CPAD - cin))).astype(jnp.bfloat16)

    # TODO(synk): m_t_modi.CausalPredictor source not provided; stand-in = linear map over the
    # flattened xm. The degenerate [B, 256] matmul is left to XLA (not worth a Pallas launch).
    xm_flat = xm.reshape(b, -1).astype(jnp.float32)
    mt = jnp.dot(xm_flat, params["causal_w"]).reshape(b, xm.shape[1], xm.shape[2])

    # concate(): F.interpolate(mt.unsqueeze(1), [Hf, Wf], bilinear, align_corners=False).
    # The channel-concat + classifier weight on the mt channel folds into an additive
    # per-pixel term (mt * wc_mt) consumed in the XLA epilogue below.
    mt_resized = jax.image.resize(mt[..., None], (b, hf, wf, 1), method="bilinear",
                                  antialias=False)
    mt_term = (mt_resized * params["wc_mt"]).reshape(n2)

    # One fused Pallas kernel: 4x (1x1 conv + ReLU) + classifier feature dot, lane-dense out.
    # (At toy pixel counts a plain XLA einsum chain would be cheaper than a kernel launch;
    # the Pallas path is kept unconditionally here to exercise the kernel.)
    z = _fused_cam_logits(x_pix, params["w_stages"], params["wc_pad"])[:, 0]   # [n2]

    # XLA epilogue (fused under jit): add mt channel of the classifier, ReLU,
    # then x[0] + x[1].flip(-1) exactly as in CAM.forward.
    logits = jnp.maximum(z + mt_term, 0.0)
    s = logits.reshape(b, hf, wf)
    return (s[0] + s[1][:, ::-1])[None]                                 # [1, Hf, Wf]


# --------------------------------- main ------------------------------------- #

if __name__ == "__main__":
    key = jax.random.PRNGKey(0)
    kp, kx, kxm = jax.random.split(key, 3)

    # batch MUST be 2 (CAM.forward does x[0] + x[1].flip(-1)); input is NCHW like PyTorch.
    x = jax.random.normal(kx, (2, 3, 64, 64), jnp.float32)
    xm = jax.random.normal(kxm, (2, 16, 16), jnp.float32)

    params = init_params(kp, xm_flat_dim=xm.shape[1] * xm.shape[2])

    out = jax.block_until_ready(cam_forward(params, x, xm))
    assert out.shape == (1, 4, 4) and out.dtype == jnp.float32
    print("KERNEL_OK")
</pallas_src>

<mosaic_0001>
module attributes {stable_mosaic.version = 11 : i64} {
  func.func @_fused_cam_kernel(%arg0: i32, %arg1: memref<16x128xbf16, #tpu.memory_space<vmem>>, %arg2: memref<4x128x128xbf16, #tpu.memory_space<vmem>>, %arg3: memref<128x128xbf16, #tpu.memory_space<vmem>>, %arg4: memref<16x128xf32, #tpu.memory_space<vmem>>) attributes {dimension_semantics = [#tpu.dimension_semantics<parallel>], iteration_bounds = array<i64: 2>, scalar_prefetch = 0 : i64, scratch_operands = 0 : i64, tpu.core_type = #tpu.core_type<tc>, window_params = [{transform_indices = @transform_0, window_bounds = array<i64: 16, 128>}, {pipeline_mode = #tpu.pipeline_mode<synchronous>, transform_indices = @transform_1, window_bounds = array<i64: 4, 128, 128>}, {pipeline_mode = #tpu.pipeline_mode<synchronous>, transform_indices = @transform_2, window_bounds = array<i64: 128, 128>}, {transform_indices = @transform_3, window_bounds = array<i64: 16, 128>}]} {
    %c0 = arith.constant 0 : index
    %c0_0 = arith.constant 0 : index
    %0 = vector.load %arg1[%c0, %c0_0] : memref<16x128xbf16, #tpu.memory_space<vmem>>, vector<16x128xbf16>
    %c0_1 = arith.constant 0 : index
    %c0_2 = arith.constant 0 : index
    %c0_3 = arith.constant 0 : index
    %1 = vector.load %arg2[%c0_1, %c0_2, %c0_3] : memref<4x128x128xbf16, #tpu.memory_space<vmem>>, vector<1x128x128xbf16>
    %2 = vector.shape_cast %1 : vector<1x128x128xbf16> to vector<128x128xbf16>
    %cst = arith.constant dense<0.000000e+00> : vector<16x128xf32>
    %3 = tpu.matmul %0, %2, %cst {dimension_numbers = #tpu.dot_dimension_numbers<[1], [0], [0], [1], [0, 0, 1, 1], [], []>} : vector<16x128xbf16>, vector<128x128xbf16>, vector<16x128xf32> -> vector<16x128xf32>
    %cst_4 = arith.constant 0.000000e+00 : f32
    %4 = vector.broadcast %cst_4 : f32 to vector<16x128xf32>
    %5 = arith.maximumf %3, %4 : vector<16x128xf32>
    %6 = arith.truncf %5 : vector<16x128xf32> to vector<16x128xbf16>
    %c1 = arith.constant 1 : index
    %c0_5 = arith.constant 0 : index
    %c0_6 = arith.constant 0 : index
    %7 = vector.load %arg2[%c1, %c0_5, %c0_6] : memref<4x128x128xbf16, #tpu.memory_space<vmem>>, vector<1x128x128xbf16>
    %8 = vector.shape_cast %7 : vector<1x128x128xbf16> to vector<128x128xbf16>
    %cst_7 = arith.constant dense<0.000000e+00> : vector<16x128xf32>
    %9 = tpu.matmul %6, %8, %cst_7 {dimension_numbers = #tpu.dot_dimension_numbers<[1], [0], [0], [1], [0, 0, 1, 1], [], []>} : vector<16x128xbf16>, vector<128x128xbf16>, vector<16x128xf32> -> vector<16x128xf32>
    %cst_8 = arith.constant 0.000000e+00 : f32
    %10 = vector.broadcast %cst_8 : f32 to vector<16x128xf32>
    %11 = arith.maximumf %9, %10 : vector<16x128xf32>
    %12 = arith.truncf %11 : vector<16x128xf32> to vector<16x128xbf16>
    %c2 = arith.constant 2 : index
    %c0_9 = arith.constant 0 : index
    %c0_10 = arith.constant 0 : index
    %13 = vector.load %arg2[%c2, %c0_9, %c0_10] : memref<4x128x128xbf16, #tpu.memory_space<vmem>>, vector<1x128x128xbf16>
    %14 = vector.shape_cast %13 : vector<1x128x128xbf16> to vector<128x128xbf16>
    %cst_11 = arith.constant dense<0.000000e+00> : vector<16x128xf32>
    %15 = tpu.matmul %12, %14, %cst_11 {dimension_numbers = #tpu.dot_dimension_numbers<[1], [0], [0], [1], [0, 0, 1, 1], [], []>} : vector<16x128xbf16>, vector<128x128xbf16>, vector<16x128xf32> -> vector<16x128xf32>
    %cst_12 = arith.constant 0.000000e+00 : f32
    %16 = vector.broadcast %cst_12 : f32 to vector<16x128xf32>
    %17 = arith.maximumf %15, %16 : vector<16x128xf32>
    %18 = arith.truncf %17 : vector<16x128xf32> to vector<16x128xbf16>
    %c3 = arith.constant 3 : index
    %c0_13 = arith.constant 0 : index
    %c0_14 = arith.constant 0 : index
    %19 = vector.load %arg2[%c3, %c0_13, %c0_14] : memref<4x128x128xbf16, #tpu.memory_space<vmem>>, vector<1x128x128xbf16>
    %20 = vector.shape_cast %19 : vector<1x128x128xbf16> to vector<128x128xbf16>
    %cst_15 = arith.constant dense<0.000000e+00> : vector<16x128xf32>
    %21 = tpu.matmul %18, %20, %cst_15 {dimension_numbers = #tpu.dot_dimension_numbers<[1], [0], [0], [1], [0, 0, 1, 1], [], []>} : vector<16x128xbf16>, vector<128x128xbf16>, vector<16x128xf32> -> vector<16x128xf32>
    %cst_16 = arith.constant 0.000000e+00 : f32
    %22 = vector.broadcast %cst_16 : f32 to vector<16x128xf32>
    %23 = arith.maximumf %21, %22 : vector<16x128xf32>
    %24 = arith.truncf %23 : vector<16x128xf32> to vector<16x128xbf16>
    %c0_17 = arith.constant 0 : index
    %c0_18 = arith.constant 0 : index
    %25 = vector.load %arg3[%c0_17, %c0_18] : memref<128x128xbf16, #tpu.memory_space<vmem>>, vector<128x128xbf16>
    %cst_19 = arith.constant dense<0.000000e+00> : vector<16x128xf32>
    %26 = tpu.matmul %24, %25, %cst_19 {dimension_numbers = #tpu.dot_dimension_numbers<[1], [0], [0], [1], [0, 0, 1, 1], [], []>} : vector<16x128xbf16>, vector<128x128xbf16>, vector<16x128xf32> -> vector<16x128xf32>
    %c0_20 = arith.constant 0 : index
    %c0_21 = arith.constant 0 : index
    %27 = vector.load %arg4[%c0_20, %c0_21] : memref<16x128xf32, #tpu.memory_space<vmem>>, vector<16x128xf32>
    tpu.vector_store %arg4[%c0_20, %c0_21], %26 {strides = array<i32>} : memref<16x128xf32, #tpu.memory_space<vmem>>, vector<16x128xf32>,
    return
  }
  func.func @transform_0(%arg0: i32) -> (i32, i32) {
    %c0_i32 = arith.constant 0 : i32
    %c0_i32_0 = arith.constant 0 : i32
    return %arg0, %c0_i32 : i32, i32
  }
  func.func @transform_1(%arg0: i32) -> (i32, i32, i32) {
    %c0_i32 = arith.constant 0 : i32
    %c0_i32_0 = arith.constant 0 : i32
    %c0_i32_1 = arith.constant 0 : i32
    %c0_i32_2 = arith.constant 0 : i32
    return %c0_i32, %c0_i32_0, %c0_i32_1 : i32, i32, i32
  }
  func.func @transform_2(%arg0: i32) -> (i32, i32) {
    %c0_i32 = arith.constant 0 : i32
    %c0_i32_0 = arith.constant 0 : i32
    %c0_i32_1 = arith.constant 0 : i32
    return %c0_i32, %c0_i32_0 : i32, i32
  }
  func.func @transform_3(%arg0: i32) -> (i32, i32) {
    %c0_i32 = arith.constant 0 : i32
    %c0_i32_0 = arith.constant 0 : i32
    return %arg0, %c0_i32 : i32, i32
  }
}

</mosaic_0001>

<bundles_post_ra>
// kernel: cam_forward.1
= control target key start
LH: loop header
LB: loop body
LE: loop exit
PB: predicated region body
PF: predicated region fallthrough
CT: control target
= control target key end

     0   :  { %s1107_s12 = smov 0   ;;  %s1301_s0 = inlined_call_operand.vmem [shape: bf16[32,128], index: 0, kind: input, shape index: {}]   ;;  %s1302_s1 = inlined_call_operand.vmem [shape: bf16[4,128,128], index: 1, kind: input, shape index: {}]   ;;  %s1303_s2 = inlined_call_operand.vmem [shape: bf16[128,128], index: 2, kind: input, shape index: {}]   ;;  %s1304_s3 = inlined_call_operand.vmem [shape: f32[32,128], index: 3, kind: output, shape index: {}]  }
   0x1 LB: > { %s781_s13 = sadd.s32 4294967295, %s1083_s12   ;;  %p785_p0 = scmp.ge.s32.totalorder %s1083_s12, 1  ;;  %s1083_s12 = sphi %s1107_s12, %s13_s12  }
   0x2   : > { %p138_p1 = scmp.lt.s32.totalorder %s1083_s12, 3 }
   0x4   : > { %p139_p2 = pnand %p785_p0, %p138_p1 }
   0x5   : > { %v1036_v0 = vld [vmem:[%s1302_s1] sm:$0xff] (!%p139_p2)   ;;  %v1085_v1 = vmov (!%p139_p2), 0.0   ;;  %v1037_v2 = vld [vmem:[%s1302_s1 + $0x8] sm:$0xff] (!%p139_p2)   ;;  %vm1086_vm0 = vmmov (!%p139_p2), 0   ;;  %s786_s18 = sshll.u32 (!%p139_p2), %s781_s13, 1  ;;  %v1038_v3 = vld [vmem:[%s1302_s1 + $0x10] sm:$0xff] (!%p139_p2)  }
   0x6   : > { %142 = sbr.rel (%p139_p2) target bundleno = 1125 (0x465), region = 32  ;;  %926 = vmatprep.subr.bf16.mxu0 (!%p139_p2), %v1085_v1  ;;  %946 = vmatprep.subr.bf16.mxu1 (!%p139_p2), %v1085_v1  ;;  %p163_p3 = scmp.lt.s32.totalorder (!%p139_p2), %s786_s18, 3  ;;  %v1045_v4 = vld [vmem:[%s1302_s1 + $0x40] sm:$0xff] (!%p139_p2)   ;;  %v1039_v5 = vld [vmem:[%s1302_s1 + $0x18] sm:$0xff] (!%p139_p2)   ;;  %v1046_v6 = vld [vmem:[%s1302_s1 + $0x48] sm:$0xff] (!%p139_p2)  }
   0x7   : > { %927 = vmatpush3.bf16.msra.mxu0 (!%p139_p2), %v1036_v0  ;;  %942 = vmatprep.mubr.msk.bf16.mxu0 (!%p139_p2), %vm1086_vm0, %v1085_v1  ;;  %v1040_v7 = vld [vmem:[%s1302_s1 + $0x20] sm:$0xff] (!%p139_p2)   ;;  %v1047_v8 = vld [vmem:[%s1302_s1 + $0x50] sm:$0xff] (!%p139_p2)   ;;  %v1041_v9 = vld [vmem:[%s1302_s1 + $0x28] sm:$0xff] (!%p139_p2)  }
   0x8   : > { %928 = vmatprep.subr.bf16.mxu0 (!%p139_p2), %v1085_v1  ;;  %962 = vmatprep.mubr.msk.bf16.mxu1 (!%p139_p2), %vm1086_vm0, %v1085_v1  ;;  %v1048_v10 = vld [vmem:[%s1302_s1 + $0x58] sm:$0xff] (!%p139_p2)   ;;  %v1042_v11 = vld [vmem:[%s1302_s1 + $0x30] sm:$0xff] (!%p139_p2)   ;;  %v1049_v12 = vld [vmem:[%s1302_s1 + $0x60] sm:$0xff] (!%p139_p2)  }
   0x9   : > { %947 = vmatpush3.bf16.msra.mxu1 (!%p139_p2), %v1045_v4  ;;  %v1043_v13 = vld [vmem:[%s1302_s1 + $0x38] sm:$0xff] (!%p139_p2)   ;;  %v1050_v14 = vld [vmem:[%s1302_s1 + $0x68] sm:$0xff] (!%p139_p2)   ;;  %v1051_v16 = vld [vmem:[%s1302_s1 + $0x70] sm:$0xff] (!%p139_p2)  }
   0xa   : > { %948 = vmatprep.subr.bf16.mxu1 (!%p139_p2), %v1085_v1  ;;  %v1052_v17 = vld [vmem:[%s1302_s1 + $0x78] sm:$0xff] (!%p139_p2)   ;;  %v1053_v18 = vld [vmem:[%s1302_s1 + $0x80] sm:$0xff] (!%p139_p2)   ;;  %v1054_v19 = vld [vmem:[%s1302_s1 + $0x88] sm:$0xff] (!%p139_p2)  }
   0xb   : > { %929 = vmatpush3.bf16.msra.mxu0 (!%p139_p2), %v1037_v2  ;;  %v1055_v20 = vld [vmem:[%s1302_s1 + $0x90] sm:$0xff] (!%p139_p2)   ;;  %v1056_v21 = vld [vmem:[%s1302_s1 + $0x98] sm:$0xff] (!%p139_p2)   ;;  %v1057_v22 = vld [vmem:[%s1302_s1 + $0xa0] sm:$0xff] (!%p139_p2)  }
   0xc   : > { %930 = vmatprep.subr.bf16.mxu0 (!%p139_p2), %v1085_v1  ;;  %v1058_v23 = vld [vmem:[%s1302_s1 + $0xa8] sm:$0xff] (!%p139_p2)   ;;  %v1059_v31 = vld [vmem:[%s1302_s1 + $0xb0] sm:$0xff] (!%p139_p2)   ;;  %v1060_v32 = vld [vmem:[%s1302_s1 + $0xb8] sm:$0xff] (!%p139_p2)  }
   0xd   : > { %s1306_s18 = smov (!%p163_p3, %s786_s18), 3  ;;  %949 = vmatpush3.bf16.msra.mxu1 %v1046_v6  ;;  %v1061_v33 = vld [vmem:[%s1302_s1 + $0xc0] sm:$0xff]   ;;  %v1062_v34 = vld [vmem:[%s1302_s1 + $0xc8] sm:$0xff]   ;;  %v1063_v35 = vld [vmem:[%s1302_s1 + $0xd0] sm:$0xff]  }
   0xe   : > { %s787_s21 = sshll.u32 %s1306_s18, 2  ;;  %950 = vmatprep.subr.bf16.mxu1 %v1085_v1  ;;  %v1064_v36 = vld [vmem:[%s1302_s1 + $0xd8] sm:$0xff]   ;;  %v1065_v37 = vld [vmem:[%s1302_s1 + $0xe0] sm:$0xff]   ;;  %v1066_v38 = vld [vmem:[%s1302_s1 + $0xe8] sm:$0xff]  }
   0xf   : > { %s1138_s24 = scalar_lea.vmem %s1301_s0, %s787_s21  ;;  %931 = vmatpush3.bf16.msra.mxu0 %v1038_v3  ;;  %v1067_v46 = vld [vmem:[%s1302_s1 + $0xf0] sm:$0xff]   ;;  %v1068_v47 = vld [vmem:[%s1302_s1 + $0xf8] sm:$0xff]   ;;  %v1069_v48 = vld [vmem:[%s1303_s2] sm:$0xff]  }
  0x10   : > { %932 = vmatprep.subr.bf16.mxu0 %v1085_v1  ;;  %v1044_v15 = vld [vmem:[%s1138_s24] sm:$0xff]   ;;  %v1070_v49 = vld [vmem:[%s1303_s2 + $0x8] sm:$0xff]   ;;  %v1071_v50 = vld [vmem:[%s1303_s2 + $0x10] sm:$0xff]   ;;  %s789_s24 = sshll.u32 %s1306_s18, 3 }
  0x11   : > { %951 = vmatpush3.bf16.msra.mxu1 %v1047_v8  ;;  %v1072_v51 = vld [vmem:[%s1303_s2 + $0x18] sm:$0xff]   ;;  %v1073_v52 = vld [vmem:[%s1303_s2 + $0x20] sm:$0xff]   ;;  %v1074_v53 = vld [vmem:[%s1303_s2 + $0x28] sm:$0xff]   ;;  %s172_s27 = scalar_lea.vmem %s1304_s3, %s789_s24 }
  0x12   : > { %952 = vmatprep.subr.bf16.mxu1 %v1085_v1  ;;  %v1075_v61 = vld [vmem:[%s1303_s2 + $0x30] sm:$0xff]   ;;  %v1076_v62 = vld [vmem:[%s1303_s2 + $0x38] sm:$0xff]  }
  0x13   : > { %933 = vmatpush3.bf16.msra.mxu0 %v1039_v5 }
  0x14   : > { %934 = vmatprep.subr.bf16.mxu0 %v1085_v1 }
  0x15   : > { %953 = vmatpush3.bf16.msra.mxu1 %v1048_v10 }
  0x16   : > { %954 = vmatprep.subr.bf16.mxu1 %v1085_v1 }
  0x17   : > { %935 = vmatpush3.bf16.msra.mxu0 %v1040_v7 }
  0x18   : > { %936 = vmatprep.subr.bf16.mxu0 %v1085_v1 }
  0x19   : > { %955 = vmatpush3.bf16.msra.mxu1 %v1049_v12 }
  0x1a   : > { %956 = vmatprep.subr.bf16.mxu1 %v1085_v1 }
  0x1b   : > { %937 = vmatpush3.bf16.msra.mxu0 %v1041_v9 }
  0x1c   : > { %938 = vmatprep.subr.bf16.mxu0 %v1085_v1 }
  0x1d   : > { %957 = vmatpush3.bf16.msra.mxu1 %v1050_v14 }
  0x1e   : > { %958 = vmatprep.subr.bf16.mxu1 %v1085_v1 }
  0x1f   : > { %939 = vmatpush3.bf16.msra.mxu0 %v1042_v11 }
  0x20   : > { %940 = vmatprep.subr.bf16.mxu0 %v1085_v1 }
  0x21   : > { %959 = vmatpush3.bf16.msra.mxu1 %v1051_v16 }
  0x22   : > { %960 = vmatprep.subr.bf16.mxu1 %v1085_v1 }
  0x23   : > { %941 = vmatpush3.bf16.msra.mxu0 %v1043_v13 }
  0x24   : > { %966 = vmatprep.subr.bf16.mxu0 %v1085_v1 }
  0x25   : > { %961 = vmatpush3.bf16.msra.mxu1 %v1052_v17 }
  0x26   : > { %943 = vmatmul.mubr.bf16.vlgmr.msra.gmra.mrb[0].mxu0 %v1044_v15  ;;  %986 = vmatprep.subr.bf16.mxu1 %v1085_v1 }
  0x27   : > { %982 = vmatprep.mubr.msk.bf16.mxu0 %vm1086_vm0, %v1085_v1  ;;  %967 = vmatpush3.bf16.msra.mxu0 %v1053_v18 }
  0x28   : > { %968 = vmatprep.subr.bf16.mxu0 %v1085_v1 }
  0x2b   : > { %969 = vmatpush3.bf16.msra.mxu0 %v1054_v19 }
  0x2c   : > { %970 = vmatprep.subr.bf16.mxu0 %v1085_v1 }
  0x2f   : > { %971 = vmatpush3.bf16.msra.mxu0 %v1055_v20 }
  0x30   : > { %972 = vmatprep.subr.bf16.mxu0 %v1085_v1 }
  0x33   : > { %973 = vmatpush3.bf16.msra.mxu0 %v1056_v21 }
  0x34   : > { %974 = vmatprep.subr.bf16.mxu0 %v1085_v1 }
  0x37   : > { %975 = vmatpush3.bf16.msra.mxu0 %v1057_v22 }
  0x38   : > { %976 = vmatprep.subr.bf16.mxu0 %v1085_v1 }
  0x3b   : > { %977 = vmatpush3.bf16.msra.mxu0 %v1058_v23 }
  0x3c   : > { %978 = vmatprep.subr.bf16.mxu0 %v1085_v1 }
  0x3f   : > { %979 = vmatpush3.bf16.msra.mxu0 %v1059_v31 }
  0x40   : > { %980 = vmatprep.subr.bf16.mxu0 %v1085_v1 }
  0x43   : > { %981 = vmatpush3.bf16.msra.mxu0 %v1060_v32 }
  0x44   : > { %1006 = vmatprep.subr.bf16.mxu0 %v1085_v1 }
  0xf9   : > { %v281_v24 = vpop.f32.mrb[0].mxu0 }
  0xfa   : > { %v944_v25 = vpop.f32.mrb[1].mxu0  ;;  %v288_v27 = vmax.f32 %v281_v24, 0.0 }
  0xfb   : > { %v284_v26 = vpop.f32.mrb[2].mxu0 }
  0xfc   : > { %v289_v28 = vmax.f32 %v284_v26, 0.0  ;;  %v945_v29 = vpop.f32.mrb[3].mxu0 }
  0xfe   : > { %v290_v30 = vpack.c.bf16 %v289_v28, %v288_v27 }
 0x100   : > { %963 = vmatmul.mubr.bf16.vlgmr.msra.gmra.mrb[0].mxu1 %v290_v30 }
 0x101   : > { %1002 = vmatprep.mubr.msk.bf16.mxu1 %vm1086_vm0, %v1085_v1  ;;  %987 = vmatpush3.bf16.msra.mxu1 %v1061_v33 }
 0x102   : > { %988 = vmatprep.subr.bf16.mxu1 %v1085_v1 }
 0x105   : > { %989 = vmatpush3.bf16.msra.mxu1 %v1062_v34 }
 0x106   : > { %990 = vmatprep.subr.bf16.mxu1 %v1085_v1 }
 0x109   : > { %991 = vmatpush3.bf16.msra.mxu1 %v1063_v35 }
 0x10a   : > { %992 = vmatprep.subr.bf16.mxu1 %v1085_v1 }
 0x10d   : > { %993 = vmatpush3.bf16.msra.mxu1 %v1064_v36 }
 0x10e   : > { %994 = vmatprep.subr.bf16.mxu1 %v1085_v1 }
 0x111   : > { %995 = vmatpush3.bf16.msra.mxu1 %v1065_v37 }
 0x112   : > { %996 = vmatprep.subr.bf16.mxu1 %v1085_v1 }
 0x115   : > { %997 = vmatpush3.bf16.msra.mxu1 %v1066_v38 }
 0x116   : > { %998 = vmatprep.subr.bf16.mxu1 %v1085_v1 }
 0x119   : > { %999 = vmatpush3.bf16.msra.mxu1 %v1067_v46 }
 0x11a   : > { %1000 = vmatprep.subr.bf16.mxu1 %v1085_v1 }
 0x11d   : > { %1001 = vmatpush3.bf16.msra.mxu1 %v1068_v47 }
 0x1d3   : > { %v390_v39 = vpop.f32.mrb[0].mxu1 }
 0x1d4   : > { %v964_v40 = vpop.f32.mrb[1].mxu1  ;;  %v397_v42 = vmax.f32 %v390_v39, 0.0 }
 0x1d5   : > { %v393_v41 = vpop.f32.mrb[2].mxu1 }
 0x1d6   : > { %v398_v43 = vmax.f32 %v393_v41, 0.0  ;;  %v965_v44 = vpop.f32.mrb[3].mxu1 }
 0x1d8   : > { %v399_v45 = vpack.c.bf16 %v398_v43, %v397_v42 }
 0x1da   : > { %983 = vmatmul.mubr.bf16.vlgmr.msra.gmra.mrb[4].mxu0 %v399_v45 }
 0x1db   : > { %1022 = vmatprep.mubr.msk.bf16.mxu0 %vm1086_vm0, %v1085_v1  ;;  %1007 = vmatpush3.bf16.msra.mxu0 %v1069_v48 }
 0x1dc   : > { %1008 = vmatprep.subr.bf16.mxu0 %v1085_v1 }
 0x1df   : > { %1009 = vmatpush3.bf16.msra.mxu0 %v1070_v49 }
 0x1e0   : > { %1010 = vmatprep.subr.bf16.mxu0 %v1085_v1 }
 0x1e3   : > { %1011 = vmatpush3.bf16.msra.mxu0 %v1071_v50 }
 0x1e4   : > { %1012 = vmatprep.subr.bf16.mxu0 %v1085_v1 }
 0x1e7   : > { %1013 = vmatpush3.bf16.msra.mxu0 %v1072_v51 }
 0x1e8   : > { %1014 = vmatprep.subr.bf16.mxu0 %v1085_v1 }
 0x1eb   : > { %1015 = vmatpush3.bf16.msra.mxu0 %v1073_v52 }
 0x1ec   : > { %1016 = vmatprep.subr.bf16.mxu0 %v1085_v1 }
 0x1ef   : > { %1017 = vmatpush3.bf16.msra.mxu0 %v1074_v53 }
 0x1f0   : > { %1018 = vmatprep.subr.bf16.mxu0 %v1085_v1 }
 0x1f3   : > { %1019 = vmatpush3.bf16.msra.mxu0 %v1075_v61 }
 0x1f4   : > { %1020 = vmatprep.subr.bf16.mxu0 %v1085_v1 }
 0x1f7   : > { %1021 = vmatpush3.bf16.msra.mxu0 %v1076_v62 }
 0x2ad   : > { %v499_v54 = vpop.f32.mrb[4].mxu0 }
 0x2ae   : > { %v984_v55 = vpop.f32.mrb[5].mxu0  ;;  %v506_v57 = vmax.f32 %v499_v54, 0.0 }
 0x2af   : > { %v502_v56 = vpop.f32.mrb[6].mxu0 }
 0x2b0   : > { %v507_v58 = vmax.f32 %v502_v56, 0.0  ;;  %v985_v59 = vpop.f32.mrb[7].mxu0 }
 0x2b2   : > { %v508_v60 = vpack.c.bf16 %v507_v58, %v506_v57 }
 0x2b4   : > { %1003 = vmatmul.mubr.bf16.vlgmr.msra.gmra.mrb[4].mxu1 %v508_v60 }
 0x387   : > { %v608_v63 = vpop.f32.mrb[4].mxu1 }
 0x388   : > { %v1004_v0 = vpop.f32.mrb[5].mxu1  ;;  %v615_v3 = vmax.f32 %v608_v63, 0.0 }
 0x389   : > { %v611_v2 = vpop.f32.mrb[6].mxu1 }
 0x38a   : > { %v616_v4 = vmax.f32 %v611_v2, 0.0  ;;  %v1005_v5 = vpop.f32.mrb[7].mxu1 }
 0x38c   : > { %v617_v6 = vpack.c.bf16 %v616_v4, %v615_v3 }
 0x38e   : > { %1023 = vmatmul.mubr.bf16.vlgmr.msra.gmra.mrb[8].mxu0 %v617_v6 }
 0x461   : > { %v716_v7 = vpop.f32.mrb[8].mxu0 }
 0x462   : > { %723 = vst [vmem:[%s172_s27] sm:$0xff] %v716_v7  ;;  %v1024_v1 = vpop.f32.mrb[9].mxu0 }
 0x463   : > { %v719_v8 = vpop.f32.mrb[10].mxu0 }
 0x464   : > { %724 = vst [vmem:[%s172_s27 + $0x8] sm:$0xff] %v719_v8  ;;  %v1025_v9 = vpop.f32.mrb[11].mxu0 }
 0x465 PF: > { %s13_s12 = sadd.s32 1, %s1083_s12  }
 0x466   : > { %p10_p4 = scmp.ge.s32.totalorder %s13_s12, 4  }
 0x468   :  { %12 = sbr.rel (!%p10_p4) target bundleno = 1 (0x1), region = 65 }

</bundles_post_ra>
